<compile_context>
chip_gen: v6e
topology: v6e:2x2x1
jax: 0.10.0
libtpu: 0.0.40
codegen_flags: <defaults>
</compile_context>

<pallas_src>
import functools

import jax
import jax.numpy as jnp
from jax.experimental import pallas as pl
from jax.experimental.pallas import tpu as pltpu


def _conv2d_kernel(x_ref, w_ref, scale_ref, shift_ref, o_ref, *, KH, stride, OH):
    """Single-invocation conv-as-GEMM.

    x_ref:     (N, H + 2*pad, W*Cin)    row-major activation (height padded)
    w_ref:     (KH, W*Cin, OW*Cout)     lane-packed structured weight
    scale_ref: (1, OW*Cout)             fused per-channel scale (bias / BN)
    shift_ref: (1, OW*Cout)             fused per-channel shift (bias / BN)
    o_ref:     (N*OH, OW*Cout)          lane-dense output rows
    """
    rows, owc = o_ref.shape
    _, _, wcin = x_ref.shape

    x = x_ref[...]                       # whole activation block (~9 KB here)
    hi = (OH - 1) * stride + 1
    acc = jnp.zeros((rows, owc), jnp.float32)

    # Static (fully unrolled) loop over the KH kernel rows: each iteration is
    # one MXU matmul (N*OH, W*Cin) @ (W*Cin, OW*Cout).  KW taps, the Cin
    # contraction and width padding are already folded into w_ref.
    for kh in range(KH):
        lhs = x[:, kh:kh + hi:stride, :].reshape(rows, wcin)   # (N*OH, W*Cin)
        acc = acc + jnp.dot(lhs, w_ref[kh],
                            preferred_element_type=jnp.float32)

    # Fused bias / eval-mode BatchNorm affine, lane-dense.
    acc = acc * scale_ref[...] + shift_ref[...]
    o_ref[...] = acc.astype(o_ref.dtype)


@functools.partial(jax.jit, static_argnames=("stride", "padding"))
def conv2d_pallas(x_nchw, weight, *, stride=1, padding=0,
                  bias=None, bn_params=None):
    """Pallas Conv_2d forward.

    x_nchw: (N, Cin, H, W)      float32
    weight: (Cout, Cin, KH, KW) float32  (PyTorch layout)
    bias:   (Cout,) or None
    bn_params: None or dict(gamma, beta, mean, var, eps)  (eval-mode BN)
    returns (N, Cout, OH, OW)
    """
    N, Cin, H, W = x_nchw.shape
    Cout, _, KH, KW = weight.shape
    OH = (H + 2 * padding - KH) // stride + 1
    OW = (W + 2 * padding - KW) // stride + 1
    WCin = W * Cin
    OWC = OW * Cout

    # ---- activation layout: NCHW -> (N, H, W*Cin), pad height only ----------
    # (transpose + reshape + pad fuse into ONE XLA copy under jit; width
    #  padding is absorbed by the structured weight below, so no padded image
    #  round-trips HBM.)
    x_rows = jnp.transpose(x_nchw, (0, 2, 3, 1)).reshape(N, H, WCin)
    x_rows = jnp.pad(x_rows, ((0, 0), (padding, padding), (0, 0)))

    # ---- lane-packed structured weight --------------------------------------
    # w_big[kh, w*Cin+ci, ow*Cout+co] = weight[co, ci, kh, w + padding - ow*stride]
    # (zero when the tap falls outside [0, KW) -> width padding built in).
    kw_i = jnp.arange(KW)[:, None, None]
    w_i = jnp.arange(W)[None, :, None]
    ow_i = jnp.arange(OW)[None, None, :]
    sel = (w_i + padding == ow_i * stride + kw_i).astype(weight.dtype)  # (KW,W,OW)
    w_big = jnp.einsum("xwv,oihx->hwivo", sel, weight).reshape(KH, WCin, OWC)

    # ---- fused per-channel affine (bias / eval-mode BatchNorm) --------------
    scale_c = jnp.ones((Cout,), jnp.float32)
    shift_c = jnp.zeros((Cout,), jnp.float32)
    if bias is not None:
        shift_c = shift_c + bias.astype(jnp.float32)
    if bn_params is not None:
        # TODO(synk): training-mode BatchNorm (batch statistics + running-stat
        # updates) is not implemented; eval-mode running-stat affine only.
        inv = jax.lax.rsqrt(bn_params["var"].astype(jnp.float32)
                            + jnp.float32(bn_params["eps"]))
        g = bn_params["gamma"].astype(jnp.float32) * inv
        scale_c = scale_c * g
        shift_c = shift_c * g + (bn_params["beta"].astype(jnp.float32)
                                 - bn_params["mean"].astype(jnp.float32) * g)
    # Tile to the lane-dense (ow*Cout + co) output layout.
    scale = jnp.tile(scale_c, OW).reshape(1, OWC)
    shift = jnp.tile(shift_c, OW).reshape(1, OWC)

    kernel = functools.partial(_conv2d_kernel, KH=KH, stride=stride, OH=OH)

    out_rows = pl.pallas_call(
        kernel,
        out_shape=jax.ShapeDtypeStruct((N * OH, OWC), jnp.float32),
        in_specs=[
            pl.BlockSpec(memory_space=pltpu.MemorySpace.VMEM),  # x_rows
            pl.BlockSpec(memory_space=pltpu.MemorySpace.VMEM),  # w_big
            pl.BlockSpec(memory_space=pltpu.MemorySpace.VMEM),  # scale
            pl.BlockSpec(memory_space=pltpu.MemorySpace.VMEM),  # shift
        ],
        out_specs=pl.BlockSpec(memory_space=pltpu.MemorySpace.VMEM),
        compiler_params=pltpu.CompilerParams(
            vmem_limit_bytes=32 * 1024 * 1024),
    )(x_rows, w_big, scale, shift)

    # (N*OH, OW*Cout) -> NCHW; reshape+transpose fuse under jit.
    out = out_rows.reshape(N, OH, OW, Cout).transpose(0, 3, 1, 2)
    return out.astype(x_nchw.dtype)


if __name__ == "__main__":
    key = jax.random.PRNGKey(0)
    k_x, k_w = jax.random.split(key)

    # Module config: Conv_2d(in_ch=4, out_ch=8, kernel_size=3, stride=1,
    #                        padding=1, bias=False, batchnorm=False)
    N, Cin, H, W = 2, 4, 16, 16
    Cout, K, stride, padding = 8, 3, 1, 1

    x = jax.random.normal(k_x, (N, Cin, H, W), dtype=jnp.float32)
    fan_in = Cin * K * K
    bound = 1.0 / (fan_in ** 0.5)
    weight = jax.random.uniform(k_w, (Cout, Cin, K, K),
                                minval=-bound, maxval=bound,
                                dtype=jnp.float32)

    out = conv2d_pallas(x, weight, stride=stride, padding=padding)
    out = jax.block_until_ready(out)

    # Silent correctness check vs XLA conv reference.
    ref = jax.lax.conv_general_dilated(
        x, weight, window_strides=(stride, stride),
        padding=[(padding, padding), (padding, padding)],
        dimension_numbers=("NCHW", "OIHW", "NCHW"))
    assert out.shape == ref.shape
    assert jnp.allclose(out, ref, atol=1e-4, rtol=1e-4)

    print("KERNEL_OK")
</pallas_src>

<mosaic_0001>
module attributes {stable_mosaic.version = 11 : i64} {
  func.func @_conv2d_kernel(%arg0: memref<2x18x64xf32, #tpu.memory_space<vmem>>, %arg1: memref<3x64x128xf32, #tpu.memory_space<vmem>>, %arg2: memref<1x128xf32, #tpu.memory_space<vmem>>, %arg3: memref<1x128xf32, #tpu.memory_space<vmem>>, %arg4: memref<32x128xf32, #tpu.memory_space<vmem>>) attributes {dimension_semantics = [], scalar_prefetch = 0 : i64, scratch_operands = 0 : i64, tpu.core_type = #tpu.core_type<tc>} {
    %c0 = arith.constant 0 : index
    %c0_0 = arith.constant 0 : index
    %c0_1 = arith.constant 0 : index
    %0 = vector.load %arg0[%c0, %c0_0, %c0_1] : memref<2x18x64xf32, #tpu.memory_space<vmem>>, vector<2x18x64xf32>
    %cst = arith.constant 0.000000e+00 : f32
    %1 = vector.broadcast %cst : f32 to vector<32x128xf32>
    %2 = vector.extract_strided_slice %0 {offsets = [0, 0, 0], sizes = [2, 16, 64], strides = [1, 1, 1]} : vector<2x18x64xf32> to vector<2x16x64xf32>
    %3 = vector.shape_cast %2 : vector<2x16x64xf32> to vector<32x64xf32>
    %c0_2 = arith.constant 0 : index
    %c0_3 = arith.constant 0 : index
    %c0_4 = arith.constant 0 : index
    %4 = vector.load %arg1[%c0_2, %c0_3, %c0_4] : memref<3x64x128xf32, #tpu.memory_space<vmem>>, vector<1x64x128xf32>
    %5 = vector.shape_cast %4 : vector<1x64x128xf32> to vector<64x128xf32>
    %cst_5 = arith.constant dense<0.000000e+00> : vector<32x128xf32>
    %6 = tpu.matmul %3, %5, %cst_5 {dimension_numbers = #tpu.dot_dimension_numbers<[1], [0], [0], [1], [0, 0, 1, 1], [], []>} : vector<32x64xf32>, vector<64x128xf32>, vector<32x128xf32> -> vector<32x128xf32>
    %7 = arith.addf %1, %6 : vector<32x128xf32>
    %8 = vector.extract_strided_slice %0 {offsets = [0, 1, 0], sizes = [2, 16, 64], strides = [1, 1, 1]} : vector<2x18x64xf32> to vector<2x16x64xf32>
    %9 = vector.shape_cast %8 : vector<2x16x64xf32> to vector<32x64xf32>
    %c1 = arith.constant 1 : index
    %c0_6 = arith.constant 0 : index
    %c0_7 = arith.constant 0 : index
    %10 = vector.load %arg1[%c1, %c0_6, %c0_7] : memref<3x64x128xf32, #tpu.memory_space<vmem>>, vector<1x64x128xf32>
    %11 = vector.shape_cast %10 : vector<1x64x128xf32> to vector<64x128xf32>
    %cst_8 = arith.constant dense<0.000000e+00> : vector<32x128xf32>
    %12 = tpu.matmul %9, %11, %cst_8 {dimension_numbers = #tpu.dot_dimension_numbers<[1], [0], [0], [1], [0, 0, 1, 1], [], []>} : vector<32x64xf32>, vector<64x128xf32>, vector<32x128xf32> -> vector<32x128xf32>
    %13 = arith.addf %7, %12 : vector<32x128xf32>
    %14 = vector.extract_strided_slice %0 {offsets = [0, 2, 0], sizes = [2, 16, 64], strides = [1, 1, 1]} : vector<2x18x64xf32> to vector<2x16x64xf32>
    %15 = vector.shape_cast %14 : vector<2x16x64xf32> to vector<32x64xf32>
    %c2 = arith.constant 2 : index
    %c0_9 = arith.constant 0 : index
    %c0_10 = arith.constant 0 : index
    %16 = vector.load %arg1[%c2, %c0_9, %c0_10] : memref<3x64x128xf32, #tpu.memory_space<vmem>>, vector<1x64x128xf32>
    %17 = vector.shape_cast %16 : vector<1x64x128xf32> to vector<64x128xf32>
    %cst_11 = arith.constant dense<0.000000e+00> : vector<32x128xf32>
    %18 = tpu.matmul %15, %17, %cst_11 {dimension_numbers = #tpu.dot_dimension_numbers<[1], [0], [0], [1], [0, 0, 1, 1], [], []>} : vector<32x64xf32>, vector<64x128xf32>, vector<32x128xf32> -> vector<32x128xf32>
    %19 = arith.addf %13, %18 : vector<32x128xf32>
    %c0_12 = arith.constant 0 : index
    %c0_13 = arith.constant 0 : index
    %20 = vector.load %arg2[%c0_12, %c0_13] : memref<1x128xf32, #tpu.memory_space<vmem>>, vector<1x128xf32>
    %21 = vector.broadcast %20 : vector<1x128xf32> to vector<32x128xf32>
    %22 = arith.mulf %19, %21 : vector<32x128xf32>
    %c0_14 = arith.constant 0 : index
    %c0_15 = arith.constant 0 : index
    %23 = vector.load %arg3[%c0_14, %c0_15] : memref<1x128xf32, #tpu.memory_space<vmem>>, vector<1x128xf32>
    %24 = vector.broadcast %23 : vector<1x128xf32> to vector<32x128xf32>
    %25 = arith.addf %22, %24 : vector<32x128xf32>
    %c0_16 = arith.constant 0 : index
    %c0_17 = arith.constant 0 : index
    %26 = vector.load %arg4[%c0_16, %c0_17] : memref<32x128xf32, #tpu.memory_space<vmem>>, vector<32x128xf32>
    tpu.vector_store %arg4[%c0_16, %c0_17], %25 {strides = array<i32>} : memref<32x128xf32, #tpu.memory_space<vmem>>, vector<32x128xf32>,
    return
  }
}

</mosaic_0001>

<bundles_post_ra>
// kernel: tile.2
= control target key start
LH: loop header
LB: loop body
LE: loop exit
PB: predicated region body
PF: predicated region fallthrough
CT: control target
= control target key end

     0   :  { %s20_s0 = inlined_call_operand.<no memory space> [shape: f32[], index: 0, kind: input, shape index: {}]   ;;  %s21_s1 = inlined_call_operand.vmem [shape: f32[1,128], index: 1, kind: output, shape index: {}]  }
   0x1   :  { %v2_v0 = vstv %s20_s0 }
   0x2   :  { %3 = vst [vmem:[%s21_s1] sm:$0x1] %v2_v0 }

// kernel: conv2d_pallas.1
= control target key start
LH: loop header
LB: loop body
LE: loop exit
PB: predicated region body
PF: predicated region fallthrough
CT: control target
= control target key end

     0   :  { %vm37_vm0 = vcmask 1046528   ;;  %vm57_vm1 = vcmask 523264   ;;  %vm244_vm2 = vcmask 1045504   ;;  %s702_s1 = inlined_call_operand.vmem [shape: f32[3,64,128], index: 1, kind: input, shape index: {}]   ;;  %s703_s0 = inlined_call_operand.vmem [shape: f32[2,18,64], index: 0, kind: input, shape index: {}]   ;;  %s704_s2 = inlined_call_operand.vmem [shape: f32[1,128], index: 2, kind: input, shape index: {}]   ;;  %s705_s3 = inlined_call_operand.vmem [shape: f32[1,128], index: 3, kind: input, shape index: {}]   ;;  %s706_s4 = inlined_call_operand.vmem [shape: f32[32,128], index: 4, kind: output, shape index: {}]  }
   0x1   :  { %v398_v0 = vld [vmem:[%s702_s1 + $0x78] sm:$0xff]  ;;  %v397_v2 = vld [vmem:[%s702_s1 + $0x70] sm:$0xff]  ;;  %v396_v4 = vld [vmem:[%s702_s1 + $0x68] sm:$0xff] }
   0x2   :  { %v30_v1 = vld [vmem:[%s702_s1 + $0x38] sm:$0xff]  ;;  %457 = vmatprep.subr.mxu0 %v398_v0  ;;  %v29_v3 = vld [vmem:[%s702_s1 + $0x30] sm:$0xff]  ;;  %v28_v5 = vld [vmem:[%s702_s1 + $0x28] sm:$0xff] }
   0x3   :  { %479 = vmatprep.subr.mxu1 %v30_v1  ;;  %458 = vmatpush3.msra.mxu0 %v398_v0  ;;  %v395_v6 = vld [vmem:[%s702_s1 + $0x60] sm:$0xff]  ;;  %v394_v8 = vld [vmem:[%s702_s1 + $0x58] sm:$0xff]  ;;  %v602_v11 = vld [vmem:[%s703_s0 + $0x8] sm:$0xff] }
   0x4   :  { %480 = vmatpush3.msra.mxu1 %v30_v1  ;;  %459 = vmatprep.subr.mxu0 %v397_v2  ;;  %v27_v7 = vld [vmem:[%s702_s1 + $0x20] sm:$0xff]  ;;  %v26_v9 = vld [vmem:[%s702_s1 + $0x18] sm:$0xff]  ;;  %v393_v12 = vld [vmem:[%s702_s1 + $0x50] sm:$0xff]  ;;  %v39_v16 = vrot.slane %v602_v11, 1  ;;  %v246_v40 = vrot.slane %v602_v11, 2 }
   0x5   :  { %481 = vmatprep.subr.mxu1 %v29_v3  ;;  %460 = vmatpush3.msra.mxu0 %v397_v2  ;;  %v597_v10 = vld [vmem:[%s703_s0] sm:$0xff]  ;;  %v25_v13 = vld [vmem:[%s702_s1 + $0x10] sm:$0xff]  ;;  %v392_v17 = vld [vmem:[%s702_s1 + $0x48] sm:$0xff] }
   0x6   :  { %482 = vmatpush3.msra.mxu1 %v29_v3  ;;  %461 = vmatprep.subr.mxu0 %v396_v4  ;;  %v613_v14 = vld [vmem:[%s703_s0 + $0x10] sm:$0x3]  ;;  %v38_v15 = vrot.slane %v597_v10, 1  ;;  %v24_v18 = vld [vmem:[%s702_s1 + $0x8] sm:$0xff]  ;;  %v391_v20 = vld [vmem:[%s702_s1 + $0x40] sm:$0xff]  ;;  %v245_v39 = vrot.slane %v597_v10, 2 }
   0x7   :  { %483 = vmatprep.subr.mxu1 %v28_v5  ;;  %462 = vmatpush3.msra.mxu0 %v396_v4  ;;  %v41_v19 = vrot.slane %v613_v14, 1  ;;  %v23_v21 = vld [vmem:[%s702_s1] sm:$0xff]  ;;  %v414_v24 = vld [vmem:[%s702_s1 + $0xb8] sm:$0xff]  ;;  %v413_v25 = vld [vmem:[%s702_s1 + $0xb0] sm:$0xff]  ;;  %v248_v43 = vrot.slane %v613_v14, 2 }
   0x8   :  { %484 = vmatpush3.msra.mxu1 %v28_v5  ;;  %463 = vmatprep.subr.mxu0 %v395_v6  ;;  %v40_v22 = vsel %vm37_vm0, %v38_v15, %v39_v16  ;;  %v20_v26 = vld [vmem:[%s703_s0 + $0x18] sm:$0xff]  ;;  %v21_v27 = vld [vmem:[%s703_s0 + $0x20] sm:$0xff]  ;;  %v412_v28 = vld [vmem:[%s702_s1 + $0xa8] sm:$0xff]  ;;  %v247_v46 = vsel %vm244_vm2, %v245_v39, %v246_v40 }
   0x9   :  { %485 = vmatprep.subr.mxu1 %v27_v7  ;;  %464 = vmatpush3.msra.mxu0 %v395_v6  ;;  %v42_v23 = vsel %vm37_vm0, %v39_v16, %v41_v19  ;;  %v22_v29 = vld [vmem:[%s703_s0 + $0x28] sm:$0x3]  ;;  %v43_v30 = vrot.slane %v20_v26, 1  ;;  %v44_v31 = vrot.slane %v21_v27, 1  ;;  %v411_v32 = vld [vmem:[%s702_s1 + $0xa0] sm:$0xff]  ;;  %v410_v34 = vld [vmem:[%s702_s1 + $0x98] sm:$0xff]  ;;  %v249_v48 = vsel %vm244_vm2, %v246_v40, %v248_v43 }
   0xa   :  { %486 = vmatpush3.msra.mxu1 %v27_v7  ;;  %465 = vmatprep.subr.mxu0 %v394_v8  ;;  %v46_v33 = vrot.slane %v22_v29, 1  ;;  %v409_v37 = vld [vmem:[%s702_s1 + $0x90] sm:$0xff]  ;;  %v408_v38 = vld [vmem:[%s702_s1 + $0x88] sm:$0xff]  ;;  %v250_v41 = vrot.slane %v20_v26, 2  ;;  %v251_v42 = vrot.slane %v21_v27, 2  ;;  %v253_v44 = vrot.slane %v22_v29, 2 }
   0xb   :  { %487 = vmatprep.subr.mxu1 %v26_v9  ;;  %466 = vmatpush3.msra.mxu0 %v394_v8  ;;  %v45_v35 = vsel %vm37_vm0, %v43_v30, %v44_v31  ;;  %v407_v45 = vld [vmem:[%s702_s1 + $0x80] sm:$0xff] }
   0xc   :  { %488 = vmatpush3.msra.mxu1 %v26_v9  ;;  %467 = vmatprep.subr.mxu0 %v393_v12  ;;  %v47_v36 = vsel %vm37_vm0, %v44_v31, %v46_v33  ;;  %v252_v47 = vsel %vm244_vm2, %v250_v41, %v251_v42  ;;  %v254_v49 = vsel %vm244_vm2, %v251_v42, %v253_v44  ;;  %v419_v61 = vld [vmem:[%s704_s2] ss:$0 sm:$0xff] }
   0xd   :  { %489 = vmatprep.subr.mxu1 %v25_v13  ;;  %468 = vmatpush3.msra.mxu0 %v393_v12  ;;  %v420_v3 = vld [vmem:[%s705_s3] ss:$0 sm:$0xff] }
   0xe   :  { %490 = vmatpush3.msra.mxu1 %v25_v13  ;;  %469 = vmatprep.subr.mxu0 %v392_v17 }
   0xf   :  { %491 = vmatprep.subr.mxu1 %v24_v18  ;;  %470 = vmatpush3.msra.mxu0 %v392_v17 }
  0x10   :  { %492 = vmatpush3.msra.mxu1 %v24_v18  ;;  %471 = vmatprep.subr.mxu0 %v391_v20 }
  0x11   :  { %493 = vmatprep.subr.mxu1 %v23_v21  ;;  %472 = vmatpush3.msra.mxu0 %v391_v20 }
  0x12   :  { %473 = vmatprep.mubr.msk.f32.mxu0 %vm57_vm1, %v40_v22  ;;  %494 = vmatpush3.msra.mxu1 %v23_v21 }
  0x13   :  { %495 = vmatprep.mubr.msk.f32.mxu1 %vm57_vm1, %v597_v10  ;;  %474 = vmatmul.mubr.msk.f32.vlgmr.msra.gmra.mxu0 %vm57_vm1, %v42_v23 }
  0x14   :  { %496 = vmatmul.mubr.msk.f32.vlgmr.msra.gmra.mxu1 %vm57_vm1, %v602_v11  ;;  %501 = vmatprep.subr.mxu0 %v414_v24 }
  0x15   :  { %523 = vmatprep.subr.mxu1 %v414_v24  ;;  %502 = vmatpush3.msra.mxu0 %v414_v24 }
  0x16   :  { %531 = vmatpush3.msra.mxu1 %v414_v24  ;;  %503 = vmatprep.subr.mxu0 %v413_v25 }
  0x17   :  { %524 = vmatprep.subr.mxu1 %v413_v25  ;;  %504 = vmatpush3.msra.mxu0 %v413_v25 }
  0x18   :  { %532 = vmatpush3.msra.mxu1 %v413_v25  ;;  %505 = vmatprep.subr.mxu0 %v412_v28 }
  0x19   :  { %525 = vmatprep.subr.mxu1 %v412_v28  ;;  %506 = vmatpush3.msra.mxu0 %v412_v28 }
  0x1a   :  { %533 = vmatpush3.msra.mxu1 %v412_v28  ;;  %507 = vmatprep.subr.mxu0 %v411_v32 }
  0x1b   :  { %526 = vmatprep.subr.mxu1 %v411_v32  ;;  %508 = vmatpush3.msra.mxu0 %v411_v32 }
  0x1c   :  { %534 = vmatpush3.msra.mxu1 %v411_v32  ;;  %509 = vmatprep.subr.mxu0 %v410_v34 }
  0x1d   :  { %527 = vmatprep.subr.mxu1 %v410_v34  ;;  %476 = vmatprep.mubr.msk.f32.mxu0 %vm57_vm1, %v45_v35 }
  0x1e   :  { %498 = vmatprep.mubr.msk.f32.mxu1 %vm57_vm1, %v20_v26  ;;  %510 = vmatpush3.msra.mxu0 %v410_v34 }
  0x1f   :  { %535 = vmatpush3.msra.mxu1 %v410_v34  ;;  %477 = vmatmul.mubr.msk.f32.gmra.mxu0 %vm57_vm1, %v47_v36 }
  0x20   :  { %499 = vmatmul.mubr.msk.f32.gmra.mxu1 %vm57_vm1, %v21_v27  ;;  %511 = vmatprep.subr.mxu0 %v409_v37 }
  0x21   :  { %528 = vmatprep.subr.mxu1 %v409_v37  ;;  %512 = vmatpush3.msra.mxu0 %v409_v37 }
  0x22   :  { %536 = vmatpush3.msra.mxu1 %v409_v37  ;;  %513 = vmatprep.subr.mxu0 %v408_v38 }
  0x23   :  { %529 = vmatprep.subr.mxu1 %v408_v38  ;;  %514 = vmatpush3.msra.mxu0 %v408_v38 }
  0x24   :  { %537 = vmatpush3.msra.mxu1 %v408_v38  ;;  %515 = vmatprep.subr.mxu0 %v407_v45 }
  0x25   :  { %530 = vmatprep.subr.mxu1 %v407_v45  ;;  %516 = vmatpush3.msra.mxu0 %v407_v45 }
  0x26   :  { %538 = vmatpush3.msra.mxu1 %v407_v45  ;;  %517 = vmatprep.mubr.msk.f32.mxu0 %vm57_vm1, %v247_v46 }
  0x27   :  { %520 = vmatprep.mubr.msk.f32.mxu1 %vm57_vm1, %v252_v47  ;;  %518 = vmatmul.mubr.msk.f32.vlgmr.msra.gmra.mxu0 %vm57_vm1, %v249_v48 }
  0x28   :  { %521 = vmatmul.mubr.msk.f32.vlgmr.msra.gmra.mxu1 %vm57_vm1, %v254_v49 }
  0xd3   :  { %v475_v50 = vpop.f32.mrf.mxu0 }
  0xd4   :  { %v497_v51 = vpop.f32.mrf.mxu1 }
  0xd5   :  { %v132_v52 = vpop.f32.mrf.mxu0  ;;  %v231_v58 = vadd.f32 %v497_v51, %v475_v50 }
  0xd6   :  { %v225_v53 = vpop.f32.mrf.mxu1 }
  0xd7   :  { %v226_v63 = vadd.f32 %v225_v53, %v132_v52 }
  0xdf   :  { %v478_v54 = vpop.f32.mrf.mxu0 }
  0xe0   :  { %v500_v55 = vpop.f32.mrf.mxu1 }
  0xe1   :  { %v142_v56 = vpop.f32.mrf.mxu0  ;;  %v241_v59 = vadd.f32 %v500_v55, %v478_v54 }
  0xe2   :  { %v235_v57 = vpop.f32.mrf.mxu1 }
  0xe3   :  { %v236_v0 = vadd.f32 %v235_v57, %v142_v56 }
  0xe7   :  { %v519_v60 = vpop.f32.mrf.mxu0 }
  0xe8   :  { %v522_v62 = vpop.f32.mrf.mxu1  ;;  %v358_v1 = vadd.f32 %v519_v60, %v231_v58 }
  0xe9   :  { %v360_v2 = vadd.f32 %v522_v62, %v241_v59  ;;  %v338_v4 = vpop.f32.mrf.mxu0 }
  0xea   :  { %v348_v5 = vpop.f32.mrf.mxu1  ;;  %v369_v6 = vmul.f32 %v419_v61, %v358_v1  ;;  %v357_v8 = vadd.f32 %v338_v4, %v226_v63 }
  0xeb   :  { %v371_v7 = vmul.f32 %v419_v61, %v360_v2  ;;  %v359_v9 = vadd.f32 %v348_v5, %v236_v0 }
  0xec   :  { %v380_v10 = vadd.f32 %v420_v3, %v369_v6  ;;  %v368_v12 = vmul.f32 %v419_v61, %v357_v8 }
  0xed   :  { %v382_v11 = vadd.f32 %v420_v3, %v371_v7  ;;  %v370_v13 = vmul.f32 %v419_v61, %v359_v9 }
  0xee   :  { %384 = vst [vmem:[%s706_s4 + $0x8] sm:$0xff] %v380_v10  ;;  %v379_v14 = vadd.f32 %v420_v3, %v368_v12 }
  0xef   :  { %386 = vst [vmem:[%s706_s4 + $0x18] sm:$0xff] %v382_v11  ;;  %v381_v15 = vadd.f32 %v420_v3, %v370_v13 }
  0xf0   :  { %383 = vst [vmem:[%s706_s4] sm:$0xff] %v379_v14 }
  0xf1   :  { %385 = vst [vmem:[%s706_s4 + $0x10] sm:$0xff] %v381_v15 }

</bundles_post_ra>
